<compile_context>
chip_gen: v6e
topology: v6e:2x2x1
jax: 0.10.0
libtpu: 0.0.40
codegen_flags: <defaults>
</compile_context>

<pallas_src>
import functools
import math

import jax
import jax.numpy as jnp
import numpy as np
from jax import lax
from jax.experimental import pallas as pl
from jax.experimental.pallas import tpu as pltpu


def _round_up(v, m):
    return ((v + m - 1) // m) * m


def _prelu(y, alpha):
    return jnp.where(y >= 0.0, y, alpha * y)


def _gcn_kernel(x_row_ref, x_col_ref, adj_ref, w_ref, b_ref, a_ref, m_ref,
                out_ref, acc_ref, sup_ref, *, n_nodes, tile_n, head_cols,
                fout_pad):
    k = pl.program_id(2)
    last_k = pl.num_programs(2) - 1

    @pl.when(k == 0)
    def _():
        acc_ref[...] = jnp.zeros_like(acc_ref)
        # Hoisted row-tile projection: independent of the reduction, so it
        # overlaps with the adjacency DMA stream instead of sitting in the
        # finalize tail.
        sup_ref[...] = jnp.dot(x_row_ref[0], w_ref[...],
                               preferred_element_type=jnp.float32)

    adj_t = adj_ref[0]
    x_t = x_col_ref[0]
    if n_nodes % tile_n != 0:
        # Edge reduction tile: zero the out-of-range adjacency columns AND the
        # matching x rows so stale buffer contents (possibly NaN) contribute
        # exactly 0 to the accumulator.  (Identity select on full tiles.)
        valid = jnp.minimum(n_nodes - k * tile_n, tile_n)
        col = lax.broadcasted_iota(jnp.int32, adj_t.shape, 1)
        adj_t = jnp.where(col < valid, adj_t, 0.0)
        row = lax.broadcasted_iota(jnp.int32, x_t.shape, 0)
        x_t = jnp.where(row < valid, x_t, 0.0)

    # Reduction over adjacency columns:  acc += adj_tile @ x_col_tile
    acc_ref[...] += jnp.dot(adj_t, x_t, preferred_element_type=jnp.float32)

    @pl.when(k == last_k)
    def _():
        sup = sup_ref[...]
        b = b_ref[...]
        a = a_ref[...]
        if head_cols == 0:
            # out_features // 10 == 0: no aggregated slice at all.
            out_ref[0] = _prelu(sup + b, a).astype(out_ref.dtype)
        elif head_cols == fout_pad:
            agg = jnp.dot(acc_ref[...], w_ref[...],
                          preferred_element_type=jnp.float32)
            m = m_ref[...]
            # torch.cat((adj @ support[..., :split], support[..., split:]), -1)
            y = jnp.where(m > 0.5, agg, sup) + b
            out_ref[0] = _prelu(y, a).astype(out_ref.dtype)
        else:
            # Wide layer: lanes >= split of agg are discarded, so only project
            # through the (lane-aligned) head columns of W and write the
            # output in two full-lane pieces.
            agg = jnp.dot(acc_ref[...], w_ref[:, :head_cols],
                          preferred_element_type=jnp.float32)
            m = m_ref[...]
            sup_h = sup[:, :head_cols]
            y_h = jnp.where(m[:, :head_cols] > 0.5, agg, sup_h) + b[:, :head_cols]
            y_t = sup[:, head_cols:] + b[:, head_cols:]
            out_ref[0, :, :head_cols] = _prelu(
                y_h, a[:, :head_cols]).astype(out_ref.dtype)
            out_ref[0, :, head_cols:] = _prelu(
                y_t, a[:, head_cols:]).astype(out_ref.dtype)


def batch_zeron_gcn_forward(x, adj, weight, bias, alpha, *, tile_n=256,
                            input_dtype=None):
    """x: (B, N, Fin), adj: (B, N, N), weight: (Fin, Fout), bias/alpha: (Fout,).

    input_dtype=jnp.bfloat16 optionally halves the adjacency/x HBM stream
    (f32 accumulation kept); default None keeps everything f32.
    """
    B, N, Fin = x.shape
    Fin_w, Fout = weight.shape
    assert Fin_w == Fin
    out_dtype = x.dtype

    split = Fout // 10

    # --- feature-dim padding: lane-dense loads / stores (128-multiple) ---
    Fin_p = _round_up(max(Fin, 128), 128)
    Fout_p = _round_up(max(Fout, 128), 128)
    if Fin_p != Fin:
        x = jnp.pad(x, ((0, 0), (0, 0), (0, Fin_p - Fin)))
        weight = jnp.pad(weight, ((0, Fin_p - Fin), (0, 0)))
    if Fout_p != Fout:
        weight = jnp.pad(weight, ((0, 0), (0, Fout_p - Fout)))
        bias = jnp.pad(bias, ((0, Fout_p - Fout),))
        alpha = jnp.pad(alpha, ((0, Fout_p - Fout),))

    b2 = bias.astype(jnp.float32).reshape(1, Fout_p)
    a2 = alpha.astype(jnp.float32).reshape(1, Fout_p)
    # 1.0 for lanes that take the aggregated head, 0.0 for pass-through lanes.
    m2 = (jnp.arange(Fout_p) < split).astype(jnp.float32).reshape(1, Fout_p)

    head_cols = 0 if split == 0 else min(Fout_p, _round_up(split, 128))

    # --- node tiling: no wrapper-side pad of adj/x along N ---
    tile_n = _round_up(max(tile_n, 128), 128)
    if N <= tile_n:
        TN = N          # single full-extent tile (always a legal block shape)
        R = 1
    else:
        TN = tile_n
        R = -(-N // TN)  # edge tiles masked inside the kernel

    if input_dtype is not None:
        x = x.astype(input_dtype)
        adj = adj.astype(input_dtype)
        weight = weight.astype(input_dtype)
    weight = weight if input_dtype is not None else weight.astype(jnp.float32)
    elem = jnp.dtype(x.dtype).itemsize

    # Advisory cost estimate (weight counted once; adj read once).
    n_ceil = R * TN
    flops = int(2 * B * n_ceil * n_ceil * Fin_p                      # adj @ x
                + 2 * B * n_ceil * Fin_p * Fout_p                    # x_row @ W
                + 2 * B * n_ceil * Fin_p * head_cols)                # acc @ W_head
    bytes_accessed = int(elem * (B * N * N + B * R * N * Fin_p + B * N * Fin_p)
                         + 4 * (Fin_p * Fout_p + 3 * Fout_p)
                         + 4 * B * N * Fout_p)

    # Explicit scoped-VMEM budget (v5e default is only 16 MiB).
    vmem_bytes = (2 * TN * TN * elem                 # adj double-buffer
                  + 4 * TN * Fin_p * elem            # x_row + x_col buffers
                  + Fin_p * Fout_p * 4               # resident weight
                  + 2 * TN * Fout_p * 4              # output double-buffer
                  + TN * (Fin_p + Fout_p) * 4        # acc + sup scratch
                  + 3 * Fout_p * 4)
    vmem_limit = int(min(max(2 * vmem_bytes, 32 * 1024 * 1024),
                         56 * 1024 * 1024))

    kernel = functools.partial(_gcn_kernel, n_nodes=N, tile_n=TN,
                               head_cols=head_cols, fout_pad=Fout_p)

    out = pl.pallas_call(
        kernel,
        out_shape=jax.ShapeDtypeStruct((B, N, Fout_p), out_dtype),
        grid_spec=pltpu.PrefetchScalarGridSpec(
            num_scalar_prefetch=0,
            grid=(B, R, R),
            in_specs=[
                pl.BlockSpec((1, TN, Fin_p), lambda b, i, k: (b, i, 0)),  # x rows of this output tile
                pl.BlockSpec((1, TN, Fin_p), lambda b, i, k: (b, k, 0)),  # x rows of reduction columns
                pl.BlockSpec((1, TN, TN), lambda b, i, k: (b, i, k)),     # adjacency tile
                pl.BlockSpec((Fin_p, Fout_p), lambda b, i, k: (0, 0)),    # weight (resident)
                pl.BlockSpec((1, Fout_p), lambda b, i, k: (0, 0)),        # bias
                pl.BlockSpec((1, Fout_p), lambda b, i, k: (0, 0)),        # PReLU slope
                pl.BlockSpec((1, Fout_p), lambda b, i, k: (0, 0)),        # head/concat mask
            ],
            out_specs=pl.BlockSpec((1, TN, Fout_p), lambda b, i, k: (b, i, 0)),
            scratch_shapes=[pltpu.VMEM((TN, Fin_p), jnp.float32),
                            pltpu.VMEM((TN, Fout_p), jnp.float32)],
        ),
        compiler_params=pltpu.CompilerParams(
            dimension_semantics=("parallel", "parallel", "arbitrary"),
            vmem_limit_bytes=vmem_limit),
        cost_estimate=pl.CostEstimate(flops=flops, transcendentals=0,
                                      bytes_accessed=bytes_accessed),
    )(x, x, adj, weight, b2, a2, m2)
    return out[:, :, :Fout]


def _reference_forward(x, adj, weight, bias, alpha):
    """Pure-JAX mirror of the PyTorch module (activation = parametric ReLU)."""
    support = jnp.einsum("bnf,fo->bno", x, weight)
    split = support.shape[-1] // 10
    head = jnp.einsum("bnm,bmo->bno", adj, support[..., :split])
    out = jnp.concatenate([head, support[..., split:]], axis=-1) + bias
    return jnp.where(out >= 0, out, alpha * out)


if __name__ == "__main__":
    def run_case(key, B, N, Fin, Fout, alpha_val):
        k_x, k_adj, k_w = jax.random.split(key, 3)
        x = jax.random.normal(k_x, (B, N, Fin), dtype=jnp.float32)
        # Dense row-normalized adjacency with self-loops.
        a = (jax.random.uniform(k_adj, (B, N, N)) < 0.2).astype(jnp.float32)
        a = a + jnp.eye(N, dtype=jnp.float32)[None]
        adj = a / jnp.sum(a, axis=-1, keepdims=True)
        # reset_parameters(): weight ~ U(-stdv, stdv), bias = uniform_(-0, 0) = 0.
        stdv = 6.0 / math.sqrt(Fin + Fout)
        weight = jax.random.uniform(k_w, (Fin, Fout), jnp.float32, -stdv, stdv)
        bias = jnp.zeros((Fout,), jnp.float32)
        alpha = jnp.full((Fout,), alpha_val, jnp.float32)

        out = jax.block_until_ready(
            batch_zeron_gcn_forward(x, adj, weight, bias, alpha))
        ref = _reference_forward(x, adj, weight, bias, alpha)
        np.testing.assert_allclose(np.asarray(out), np.asarray(ref),
                                   rtol=1e-3, atol=1e-3)

    key = jax.random.PRNGKey(0)
    k1, k2, k3 = jax.random.split(key, 3)
    # Single-tile path (TN = N), activation == F.relu.
    run_case(k1, B=2, N=16, Fin=32, Fout=32, alpha_val=0.0)
    # Multi-tile reduction path with in-kernel edge masking (N % 256 != 0),
    # activation == default nn.PReLU.
    run_case(k2, B=2, N=320, Fin=48, Fout=64, alpha_val=0.25)
    # Wide-output path: head projection sliced to W[:, :128] (Fout_pad = 256).
    run_case(k3, B=2, N=64, Fin=48, Fout=256, alpha_val=0.25)
    print("KERNEL_OK")
</pallas_src>

<mosaic_0001>
module attributes {stable_mosaic.version = 11 : i64} {
  func.func @_gcn_kernel(%arg0: i32, %arg1: i32, %arg2: i32, %arg3: memref<1x16x128xf32, #tpu.memory_space<vmem>>, %arg4: memref<1x16x128xf32, #tpu.memory_space<vmem>>, %arg5: memref<1x16x16xf32, #tpu.memory_space<vmem>>, %arg6: memref<128x128xf32, #tpu.memory_space<vmem>>, %arg7: memref<1x128xf32, #tpu.memory_space<vmem>>, %arg8: memref<1x128xf32, #tpu.memory_space<vmem>>, %arg9: memref<1x128xf32, #tpu.memory_space<vmem>>, %arg10: memref<1x16x128xf32, #tpu.memory_space<vmem>>, %arg11: memref<16x128xf32, #tpu.memory_space<vmem>>, %arg12: memref<16x128xf32, #tpu.memory_space<vmem>>) attributes {dimension_semantics = [#tpu.dimension_semantics<parallel>, #tpu.dimension_semantics<parallel>, #tpu.dimension_semantics<arbitrary>], iteration_bounds = array<i64: 2, 1, 1>, scalar_prefetch = 0 : i64, scratch_operands = 2 : i64, tpu.core_type = #tpu.core_type<tc>, window_params = [{transform_indices = @transform_0, window_bounds = array<i64: 1, 16, 128>}, {transform_indices = @transform_1, window_bounds = array<i64: 1, 16, 128>}, {transform_indices = @transform_2, window_bounds = array<i64: 1, 16, 16>}, {pipeline_mode = #tpu.pipeline_mode<synchronous>, transform_indices = @transform_3, window_bounds = array<i64: 128, 128>}, {pipeline_mode = #tpu.pipeline_mode<synchronous>, transform_indices = @transform_4, window_bounds = array<i64: 1, 128>}, {pipeline_mode = #tpu.pipeline_mode<synchronous>, transform_indices = @transform_5, window_bounds = array<i64: 1, 128>}, {pipeline_mode = #tpu.pipeline_mode<synchronous>, transform_indices = @transform_6, window_bounds = array<i64: 1, 128>}, {transform_indices = @transform_7, window_bounds = array<i64: 1, 16, 128>}]} {
    %c0_i32 = arith.constant 0 : i32
    %0 = arith.cmpi eq, %arg2, %c0_i32 : i32
    %1 = arith.extui %0 : i1 to i32
    %c0_i32_0 = arith.constant 0 : i32
    %2 = arith.cmpi ne, %1, %c0_i32_0 : i32
    scf.if %2 {
      %cst_12 = arith.constant 0.000000e+00 : f32
      %14 = vector.broadcast %cst_12 : f32 to vector<16x128xf32>
      %c0_13 = arith.constant 0 : index
      %c0_14 = arith.constant 0 : index
      %15 = vector.load %arg11[%c0_13, %c0_14] : memref<16x128xf32, #tpu.memory_space<vmem>>, vector<16x128xf32>
      tpu.vector_store %arg11[%c0_13, %c0_14], %14 {strides = array<i32>} : memref<16x128xf32, #tpu.memory_space<vmem>>, vector<16x128xf32>,
      %c0_15 = arith.constant 0 : index
      %c0_16 = arith.constant 0 : index
      %c0_17 = arith.constant 0 : index
      %16 = vector.load %arg3[%c0_15, %c0_16, %c0_17] : memref<1x16x128xf32, #tpu.memory_space<vmem>>, vector<1x16x128xf32>
      %17 = vector.shape_cast %16 : vector<1x16x128xf32> to vector<16x128xf32>
      %c0_18 = arith.constant 0 : index
      %c0_19 = arith.constant 0 : index
      %18 = vector.load %arg6[%c0_18, %c0_19] : memref<128x128xf32, #tpu.memory_space<vmem>>, vector<128x128xf32>
      %cst_20 = arith.constant dense<0.000000e+00> : vector<16x128xf32>
      %19 = tpu.matmul %17, %18, %cst_20 {dimension_numbers = #tpu.dot_dimension_numbers<[1], [0], [0], [1], [0, 0, 1, 1], [], []>} : vector<16x128xf32>, vector<128x128xf32>, vector<16x128xf32> -> vector<16x128xf32>
      %c0_21 = arith.constant 0 : index
      %c0_22 = arith.constant 0 : index
      %20 = vector.load %arg12[%c0_21, %c0_22] : memref<16x128xf32, #tpu.memory_space<vmem>>, vector<16x128xf32>
      tpu.vector_store %arg12[%c0_21, %c0_22], %19 {strides = array<i32>} : memref<16x128xf32, #tpu.memory_space<vmem>>, vector<16x128xf32>,
    } else {
    }
    %c0 = arith.constant 0 : index
    %c0_1 = arith.constant 0 : index
    %c0_2 = arith.constant 0 : index
    %3 = vector.load %arg5[%c0, %c0_1, %c0_2] : memref<1x16x16xf32, #tpu.memory_space<vmem>>, vector<1x16x16xf32>
    %4 = vector.shape_cast %3 : vector<1x16x16xf32> to vector<16x16xf32>
    %c0_3 = arith.constant 0 : index
    %c0_4 = arith.constant 0 : index
    %c0_5 = arith.constant 0 : index
    %5 = vector.load %arg4[%c0_3, %c0_4, %c0_5] : memref<1x16x128xf32, #tpu.memory_space<vmem>>, vector<1x16x128xf32>
    %6 = vector.shape_cast %5 : vector<1x16x128xf32> to vector<16x128xf32>
    %c0_6 = arith.constant 0 : index
    %c0_7 = arith.constant 0 : index
    %7 = vector.load %arg11[%c0_6, %c0_7] : memref<16x128xf32, #tpu.memory_space<vmem>>, vector<16x128xf32>
    %cst = arith.constant dense<0.000000e+00> : vector<16x128xf32>
    %8 = tpu.matmul %4, %6, %cst {dimension_numbers = #tpu.dot_dimension_numbers<[1], [0], [0], [1], [0, 0, 1, 1], [], []>} : vector<16x16xf32>, vector<16x128xf32>, vector<16x128xf32> -> vector<16x128xf32>
    %9 = arith.addf %7, %8 : vector<16x128xf32>
    %c0_8 = arith.constant 0 : index
    %c0_9 = arith.constant 0 : index
    %10 = vector.load %arg11[%c0_8, %c0_9] : memref<16x128xf32, #tpu.memory_space<vmem>>, vector<16x128xf32>
    tpu.vector_store %arg11[%c0_8, %c0_9], %9 {strides = array<i32>} : memref<16x128xf32, #tpu.memory_space<vmem>>, vector<16x128xf32>,
    %c0_i32_10 = arith.constant 0 : i32
    %11 = arith.cmpi eq, %arg2, %c0_i32_10 : i32
    %12 = arith.extui %11 : i1 to i32
    %c0_i32_11 = arith.constant 0 : i32
    %13 = arith.cmpi ne, %12, %c0_i32_11 : i32
    scf.if %13 {
      %c0_12 = arith.constant 0 : index
      %c0_13 = arith.constant 0 : index
      %14 = vector.load %arg12[%c0_12, %c0_13] : memref<16x128xf32, #tpu.memory_space<vmem>>, vector<16x128xf32>
      %c0_14 = arith.constant 0 : index
      %c0_15 = arith.constant 0 : index
      %15 = vector.load %arg7[%c0_14, %c0_15] : memref<1x128xf32, #tpu.memory_space<vmem>>, vector<1x128xf32>
      %c0_16 = arith.constant 0 : index
      %c0_17 = arith.constant 0 : index
      %16 = vector.load %arg8[%c0_16, %c0_17] : memref<1x128xf32, #tpu.memory_space<vmem>>, vector<1x128xf32>
      %c0_18 = arith.constant 0 : index
      %c0_19 = arith.constant 0 : index
      %17 = vector.load %arg11[%c0_18, %c0_19] : memref<16x128xf32, #tpu.memory_space<vmem>>, vector<16x128xf32>
      %c0_20 = arith.constant 0 : index
      %c0_21 = arith.constant 0 : index
      %18 = vector.load %arg6[%c0_20, %c0_21] : memref<128x128xf32, #tpu.memory_space<vmem>>, vector<128x128xf32>
      %cst_22 = arith.constant dense<0.000000e+00> : vector<16x128xf32>
      %19 = tpu.matmul %17, %18, %cst_22 {dimension_numbers = #tpu.dot_dimension_numbers<[1], [0], [0], [1], [0, 0, 1, 1], [], []>} : vector<16x128xf32>, vector<128x128xf32>, vector<16x128xf32> -> vector<16x128xf32>
      %c0_23 = arith.constant 0 : index
      %c0_24 = arith.constant 0 : index
      %20 = vector.load %arg9[%c0_23, %c0_24] : memref<1x128xf32, #tpu.memory_space<vmem>>, vector<1x128xf32>
      %cst_25 = arith.constant 5.000000e-01 : f32
      %21 = vector.broadcast %cst_25 : f32 to vector<1x128xf32>
      %22 = arith.cmpf ogt, %20, %21 : vector<1x128xf32>
      %23 = vector.shape_cast %22 : vector<1x128xi1> to vector<1x128xi1>
      %24 = vector.broadcast %23 : vector<1x128xi1> to vector<16x128xi1>
      %25 = arith.select %24, %19, %14 : vector<16x128xi1>, vector<16x128xf32>
      %26 = vector.broadcast %15 : vector<1x128xf32> to vector<16x128xf32>
      %27 = arith.addf %25, %26 : vector<16x128xf32>
      %cst_26 = arith.constant 0.000000e+00 : f32
      %28 = vector.broadcast %cst_26 : f32 to vector<16x128xf32>
      %29 = arith.cmpf oge, %27, %28 : vector<16x128xf32>
      %30 = vector.broadcast %16 : vector<1x128xf32> to vector<16x128xf32>
      %31 = arith.mulf %30, %27 : vector<16x128xf32>
      %32 = arith.select %29, %27, %31 : vector<16x128xi1>, vector<16x128xf32>
      %c0_27 = arith.constant 0 : index
      %c0_28 = arith.constant 0 : index
      %c0_29 = arith.constant 0 : index
      %33 = vector.load %arg10[%c0_27, %c0_28, %c0_29] : memref<1x16x128xf32, #tpu.memory_space<vmem>>, vector<1x16x128xf32>
      %34 = vector.shape_cast %33 : vector<1x16x128xf32> to vector<16x128xf32>
      %35 = vector.shape_cast %32 : vector<16x128xf32> to vector<1x16x128xf32>
      tpu.vector_store %arg10[%c0_27, %c0_28, %c0_29], %35 {strides = array<i32>} : memref<1x16x128xf32, #tpu.memory_space<vmem>>, vector<1x16x128xf32>,
    } else {
    }
    return
  }
  func.func @transform_0(%arg0: i32, %arg1: i32, %arg2: i32) -> (i32, i32, i32) {
    %c0_i32 = arith.constant 0 : i32
    %c0_i32_0 = arith.constant 0 : i32
    return %arg0, %arg1, %c0_i32 : i32, i32, i32
  }
  func.func @transform_1(%arg0: i32, %arg1: i32, %arg2: i32) -> (i32, i32, i32) {
    %c0_i32 = arith.constant 0 : i32
    %c0_i32_0 = arith.constant 0 : i32
    return %arg0, %arg2, %c0_i32 : i32, i32, i32
  }
  func.func @transform_2(%arg0: i32, %arg1: i32, %arg2: i32) -> (i32, i32, i32) {
    %c0_i32 = arith.constant 0 : i32
    return %arg0, %arg1, %arg2 : i32, i32, i32
  }
  func.func @transform_3(%arg0: i32, %arg1: i32, %arg2: i32) -> (i32, i32) {
    %c0_i32 = arith.constant 0 : i32
    %c0_i32_0 = arith.constant 0 : i32
    %c0_i32_1 = arith.constant 0 : i32
    return %c0_i32, %c0_i32_0 : i32, i32
  }
  func.func @transform_4(%arg0: i32, %arg1: i32, %arg2: i32) -> (i32, i32) {
    %c0_i32 = arith.constant 0 : i32
    %c0_i32_0 = arith.constant 0 : i32
    %c0_i32_1 = arith.constant 0 : i32
    return %c0_i32, %c0_i32_0 : i32, i32
  }
  func.func @transform_5(%arg0: i32, %arg1: i32, %arg2: i32) -> (i32, i32) {
    %c0_i32 = arith.constant 0 : i32
    %c0_i32_0 = arith.constant 0 : i32
    %c0_i32_1 = arith.constant 0 : i32
    return %c0_i32, %c0_i32_0 : i32, i32
  }
  func.func @transform_6(%arg0: i32, %arg1: i32, %arg2: i32) -> (i32, i32) {
    %c0_i32 = arith.constant 0 : i32
    %c0_i32_0 = arith.constant 0 : i32
    %c0_i32_1 = arith.constant 0 : i32
    return %c0_i32, %c0_i32_0 : i32, i32
  }
  func.func @transform_7(%arg0: i32, %arg1: i32, %arg2: i32) -> (i32, i32, i32) {
    %c0_i32 = arith.constant 0 : i32
    %c0_i32_0 = arith.constant 0 : i32
    return %arg0, %arg1, %c0_i32 : i32, i32, i32
  }
}

</mosaic_0001>

<bundles_post_ra>
// kernel: tpu_custom_call.1
= control target key start
LH: loop header
LB: loop body
LE: loop exit
PB: predicated region body
PF: predicated region fallthrough
CT: control target
= control target key end

     0   :  { %s1666_s0 = inlined_call_operand.hbm [shape: f32[2,16,128], index: 0, kind: input, shape index: {}]   ;;  %s1667_s1 = inlined_call_operand.hbm [shape: f32[2,16,128], index: 1, kind: input, shape index: {}]   ;;  %s1668_s2 = inlined_call_operand.hbm [shape: f32[2,16,16], index: 2, kind: input, shape index: {}]   ;;  %s1669_s3 = inlined_call_operand.hbm [shape: f32[128,128], index: 3, kind: input, shape index: {}]   ;;  %s1670_s4 = inlined_call_operand.vmem [shape: f32[1,128], index: 4, kind: input, shape index: {}]   ;;  %s1671_s5 = inlined_call_operand.vmem [shape: f32[1,128], index: 5, kind: input, shape index: {}]   ;;  %s1672_s6 = inlined_call_operand.vmem [shape: f32[1,128], index: 6, kind: input, shape index: {}]   ;;  %s1673_s7 = inlined_call_operand.hbm [shape: f32[2,16,128], index: 7, kind: output, shape index: {}]  }
   0x1   :  { %1686 = sst [smem:[#allocation22_spill]] %s1666_s0 }
   0x2   :  { %1687 = sst [smem:[#allocation23_spill]] %s1667_s1 }
   0x3   :  { %12 = vsyncpa [#allocation5], 0 }
   0x4   :  { %14 = vsyncpa [#allocation5 + $0x1], 0 }
   0x5   :  { %15 = vsyncpa [#allocation8], 0 }
   0x6   :  { %17 = vsyncpa [#allocation8 + $0x1], 0 }
   0x7   :  { %18 = vsyncpa [#allocation11], 0 }
   0x8   :  { %19 = vsyncpa [#allocation6], 0 }
   0x9   :  { %21 = vsyncpa [#allocation6 + $0x1], 0  ;;  %s1408_s24 = smov 0   ;;  %s1410_s25 = smov 0  }
   0xa   :  { %s1412_s26 = smov 0   ;;  %s1414_s27 = smov 0  }
   0xb   :  { %s1416_s28 = smov 0   ;;  %s1418_s29 = smov 0  }
   0xc LB: > { %1688 = sst [smem:[#allocation17_spill]] %s1352_s28  ;;  %s46_s30 = sadd.s32 1, %s1352_s28  ;;  %s1356_s29 = sphi %s1418_s29, %s27_s29   ;;  %s1352_s28 = sphi %s1416_s28, %s1713_s28   ;;  %s1348_s27 = sphi %s1414_s27, %s1712_s27   ;;  %s1344_s26 = sphi %s1412_s26, %s1716_s26   ;;  %s1340_s25 = sphi %s1410_s25, %s1715_s25   ;;  %s1336_s24 = sphi %s1408_s24, %s1714_s24  }
   0xd   : > { %1689 = sst [smem:[#allocation18_spill]] %s1356_s29  ;;  %s55_s8 = sadd.s32 1, %s1344_s26 }
   0xe   : > { %p48_p0 = scmp.ge.s32.totalorder %s46_s30, 2  ;;  %p62_p1 = scmp.ne.s32.totalorder %s1344_s26, %s1340_s25 }
   0xf   : > { %p63_p2 = scmp.eq.s32.totalorder %s1356_s29, 0  ;;  %p1101_p6 = scmp.lt.s32.totalorder %s1356_s29, 2 }
  0x10   : > { %s1718_s30 = smov (%p48_p0, %s46_s30), 0  ;;  %s1678_s10 = sand.u32 1, %s1344_s26  }
  0x11   : > { %1690 = sst [smem:[#allocation19_spill]] %s1718_s30  ;;  %p64_p3 = por %p63_p2, %p62_p1 }
  0x12   : > { %s50_s9 = ssub.s32 %s1352_s28, %s1718_s30  ;;  %s1454_s11 = sshll.u32 %s1352_s28, 8 }
  0x13   : > { %p53_p5 = scmp.eq.s32.totalorder %s50_s9, 0  ;;  %s1461_s13 = sshll.u32 %s1678_s10, 4 }
  0x14   : > { %p1463_p7 = pnand %p1101_p6, %p64_p3  ;;  %s307_s15 = sand.u32 1, %s1356_s29  }
  0x15   : > { %s1457_s12 = scalar_select %p53_p5, %s1344_s26, %s55_s8  }
  0x16   : > { %s1693_s1 = sld [smem:[#allocation23_spill]]  ;;  %s311_s19 = scalar_lea.vmem [#allocation7], %s1461_s13 }
  0x17   : > { %1691 = sst [smem:[#allocation20_spill]] %s1457_s12  ;;  %s320_s20 = sshll.u32 %s311_s19, 4  ;;  %s321_s20 = int_to_ptr.vmem [resolvable:$true] %s320_s20 }
  0x18   : > { %s1473_s21 = scalar_lea.sflag [#allocation8], %s307_s15  ;;  %p1685_p8 = pneg %p1463_p7 }
  0x19   : > { %s1171_s22 = scalar_lea.vmem %s321_s20, 256  ;;  %s1358_s23 = smov [#allocation7]  }
  0x1a   : > { %p1172_p9 = scmp.ne.s32.totalorder %s321_s20, %s1171_s22  ;;  %s1176_s8 = sshll.u32 %s1358_s23, 4  ;;  %s1177_s8 = int_to_ptr.vmem [resolvable:$false] %s1176_s8 }
  0x1b   : > { %s1178_s9 = scalar_lea.vmem %s1177_s8, 512  ;;  %p1179_p12 = scmp.lt.s32.totalorder %s321_s20, %s1177_s8 }
  0x1c   : > { %s319_s18 = scalar_lea.hbm %s1693_s1, %s1454_s11  ;;  %p1174_p10 = pnand %p1172_p9, %p1685_p8 }
  0x1d   : > { %p1180_p13 = scmp.lt.s32.totalorder %s1178_s9, %s1171_s22 }
  0x1e   : > { %p1175_p11 = pneg %p1174_p10 }
  0x1f   : > { %p1181_p0 = por %p1180_p13, %p1179_p12 }
  0x21   : > { %p1182_p2 = pnand %p1181_p0, %p1175_p11 }
  0x23   : > { %1185 = shalt.err (!%p1182_p2)
}
  0x24   : > { %s1674_s16 = smov 128   ;;  %s1676_s15 = smov 8  }
  0x25   : > { %1092 = dma.hbm_to_vmem [thread:$0]  (!%p1463_p7), %s319_s18, 256, %s321_s20, %s1473_s21, %s1674_s16, %s1674_s16, %s1676_s15  }
  0x26   : > { %s1487_s17 = sadd.s32 4294967295, %s1356_s29   ;;  %s921_s19 = sadd.s32 4294967294, %s1356_s29  }
  0x27   : > { %p68_p3 = scmp.ne.s32.totalorder %s1340_s25, %s1336_s24  ;;  %p1684_p5 = scmp.eq.s32.totalorder %s1487_s17, 0 }
  0x28   : > { %p236_p6 = scmp.eq.s32.totalorder %s1487_s17, 1  ;;  %p242_p9 = scmp.eq.s32.totalorder %s921_s19, 1 }
  0x29   : > { %p922_p10 = scmp.ge.s32.totalorder %s1356_s29, 1  ;;  %p1497_p11 = por %p1684_p5, %p68_p3 }
  0x2a   : > { %p1504_p12 = por %p236_p6, %p62_p1  ;;  %p1508_p13 = por %p242_p9, %p68_p3 }
  0x2b   : > { %p249_p0 = scmp.lt.s32.totalorder %s1356_s29, 3  ;;  %s1361_s8 = smov [#allocation10]  }
  0x2c   : > { %s1696_s20 = scalar_select %p1508_p13, 1, 0 }
  0x2d   : > { %p1513_p2 = pnand %p922_p10, %p249_p0  ;;  %s261_s9 = sshll.u32 %s1361_s8, 4  ;;  %s1517_s9 = int_to_ptr.vmem [resolvable:$true] %s261_s9 }
  0x2e   : > { %1697 = sst [smem:[#allocation21_spill]] %s1696_s20  ;;  %s288_s10 = scalar_lea.vmem [#allocation4], %s1461_s13 }
  0x2f   : > { %p1082_p1 = pneg %p1513_p2  ;;  %s1699_s0 = sld [smem:[#allocation22_spill]] }
  0x30   : > { %s297_s1 = sshll.u32 %s288_s10, 4  ;;  %s1701_s28 = sand.u32 1, %s1344_s26   ;;  %s298_s1 = int_to_ptr.vmem [resolvable:$true] %s297_s1 }
  0x31   : > { %p1528_p3 = pnand %p1082_p1, %p1684_p5  ;;  %s285_s12 = scalar_lea.sflag [#allocation5], %s1701_s28 }
  0x32   : > { %s1199_s29 = scalar_lea.vmem %s298_s1, 256  ;;  %s1362_s8 = smov [#allocation4]  }
  0x33   : > { %p1200_p6 = scmp.ne.s32.totalorder %s298_s1, %s1199_s29  ;;  %s1204_s20 = sshll.u32 %s1362_s8, 4  ;;  %s1205_s20 = int_to_ptr.vmem [resolvable:$false] %s1204_s20 }
  0x34   : > { %s1206_s16 = scalar_lea.vmem %s1205_s20, 512  ;;  %p1207_p0 = scmp.lt.s32.totalorder %s298_s1, %s1205_s20 }
  0x35   : > { %s296_s15 = scalar_lea.hbm %s1699_s0, %s1454_s11  ;;  %p1202_p9 = pnand %p1200_p6, %p1685_p8 }
  0x36   : > { %p1208_p4 = scmp.lt.s32.totalorder %s1206_s16, %s1199_s29 }
  0x37   : > { %p1203_p10 = pneg %p1202_p9 }
  0x38   : > { %p1209_p13 = por %p1208_p4, %p1207_p0 }
  0x3a   : > { %p1210_p1 = pnand %p1209_p13, %p1203_p10 }
  0x3c   : > { %1213 = shalt.err (!%p1210_p1)
}
  0x3d   : > { %s1702_s10 = smov 8   ;;  %s1703_s19 = smov 128  }
  0x3e   : > { %1089 = dma.hbm_to_vmem [thread:$0]  (!%p1463_p7), %s296_s15, 256, %s298_s1, %s285_s12, %s1703_s19, %s1703_s19, %s1702_s10  }
  0x3f   : > { %p1216_p6 = pneg %p1528_p3  ;;  %s1225_s28 = scalar_lea.vmem %s1517_s9, 2048 }
  0x40   : > { %p1226_p9 = scmp.ne.s32.totalorder %s1517_s9, %s1225_s28  ;;  %p1233_p4 = scmp.lt.s32.totalorder %s1517_s9, %s1517_s9 }
  0x41   : > { %p1234_p13 = scmp.lt.s32.totalorder %s1225_s28, %s1225_s28 }
  0x42   : > { %p1228_p5 = pnand %p1226_p9, %p1216_p6 }
  0x43   : > { %p1235_p10 = por %p1234_p13, %p1233_p4 }
  0x44   : > { %p1229_p8 = pneg %p1228_p5 }
  0x46   : > { %p1236_p0 = pnand %p1235_p10, %p1229_p8 }
  0x48   : > { %1239 = shalt.err (!%p1236_p0)
}
  0x49   : > { %1085 = dma.hbm_to_vmem [thread:$0]  (!%p1528_p3), %s1669_s3, 2048, %s1517_s9, [#allocation11], %s1703_s19, %s1703_s19, %s1702_s10  }
  0x4a   : > { %s343_s20 = scalar_lea.hbm %s1668_s2, %s1454_s11  ;;  %s334_s8 = scalar_lea.vmem [#allocation9], %s1461_s13 }
  0x4b   : > { %s344_s16 = sshll.u32 %s334_s8, 4  ;;  %p1704_p5 = pneg %p1463_p7  ;;  %s345_s16 = int_to_ptr.vmem [resolvable:$true] %s344_s16 }
  0x4c   : > { %s1253_s28 = scalar_lea.vmem %s345_s16, 256  ;;  %s1363_s30 = smov [#allocation9]  }
  0x4d   : > { %p1254_p8 = scmp.ne.s32.totalorder %s345_s16, %s1253_s28  ;;  %s1258_s0 = sshll.u32 %s1363_s30, 4  ;;  %s1259_s0 = int_to_ptr.vmem [resolvable:$false] %s1258_s0 }
  0x4e   : > { %s1260_s29 = scalar_lea.vmem %s1259_s0, 512  ;;  %p1261_p9 = scmp.lt.s32.totalorder %s345_s16, %s1259_s0 }
  0x4f   : > { %p1256_p1 = pnand %p1254_p8, %p1704_p5  ;;  %p1262_p4 = scmp.lt.s32.totalorder %s1260_s29, %s1253_s28 }
  0x51   : > { %p1257_p6 = pneg %p1256_p1  ;;  %p1263_p3 = por %p1262_p4, %p1261_p9 }
  0x53   : > { %p1264_p13 = pnand %p1263_p3, %p1257_p6 }
  0x55   : > { %1267 = shalt.err (!%p1264_p13)
}
  0x56   : > { %1095 = dma.hbm_to_vmem [thread:$0]  (!%p1463_p7), %s343_s20, 256, %s345_s16, %s1473_s21, %s1703_s19, %s1703_s19, %s1702_s10  }
  0x57   : > { %356 = sbr.rel (%p1513_p2) target bundleno = 515 (0x203), region = 48  ;;  %s1574_s11 = sand.u32 (!%p1513_p2), 1, %s1340_s25  }
  0x58   : > { %s1577_s0 = sshll.u32 (!%p1513_p2), %s1574_s11, 4  ;;  %s359_s13 = scalar_lea.sflag (!%p1513_p2), [#allocation5], %s1574_s11 }
  0x59   : > { %s362_s9 = scalar_lea.vmem (!%p1513_p2), [#allocation4], %s1577_s0 }
  0x5c   : > { %1319 = dma.done.wait (%p1497_p11), %s359_s13, 256  }
  0x5d   : > { %1321 = vsyncadd (%p1497_p11), %s359_s13, 4294967040  ;;  %s367_s14 = sand.u32 1, %s1487_s17   ;;  %s371_s23 = scalar_lea.vmem [#allocation7], %s1577_s0 }
  0x5e   : > { %s368_s21 = scalar_lea.sflag [#allocation8], %s367_s14 }
  0x5f   : > { %1323 = dma.done.wait (%p1497_p11), %s368_s21, 512  }
  0x60   : > { %1325 = vsyncadd (%p1497_p11), %s368_s21, 4294966784  ;;  %s380_s10 = scalar_lea.vmem [#allocation9], %s1577_s0  ;;  %p1705_p7 = scmp.eq.s32.totalorder %s1487_s17, 0 }
  0x62   : > { %1327 = dma.done.wait (%p1705_p7), [#allocation11], 2048   ;;  %p1706_p2 = pmov %p1705_p7 }
  0x63   : > { %vm536_vm0 = vcmask 130048   ;;  %v533_v0 = vld [vmem:[%s371_s23 + $0x8] sm:$0xff]  ;;  %v532_v1 = vld [vmem:[%s371_s23] sm:$0xff]  ;;  %v725_v24 = vlaneseq  ;;  %v1364_v28 = vmov 0   ;;  %s424_s20 = scalar_lea.vmem [#allocation12], %s1577_s0  ;;  %s952_s16 = sshll.u32 %s1348_s27, 8 }
  0x64   : > { %1329 = vsyncadd (%p1706_p2), [#allocation11], 4294965248  ;;  %v530_v2 = vld [vmem:[%s380_s10] sm:$0xff]  ;;  %1028 = vmatprep.subr.mxu1 %v533_v0  ;;  %v452_v3 = vld [vmem:[#allocation10 + $0x78] sm:$0xff]  ;;  %s770_s8 = sshll.u32 %s424_s20, 4  ;;  %s1618_s29 = scalar_lea.hbm %s1673_s7, %s952_s16  ;;  %s1613_s8 = int_to_ptr.vmem [resolvable:$true] %s770_s8 }
  0x65   : > { %1032 = vmatprep.mubr.msk.f32.mxu1 %vm536_vm0, %v530_v2  ;;  %v451_v4 = vld [vmem:[#allocation10 + $0x70] sm:$0xff]  ;;  %1029 = vmatpush3.msra.mxu1 %v533_v0  ;;  %v531_v5 = vld [vmem:[%s380_s10 + $0x8] sm:$0xff]  ;;  %v449_v7 = vld [vmem:[#allocation10 + $0x60] sm:$0xff]  ;;  %v726_v26 = vshrl.u32 %v725_v24, 7  ;;  %s755_s27 = scalar_lea.sflag [#allocation6], %s1574_s11  ;;  %s1268_s0 = scalar_lea.vmem %s1613_s8, 256 }
  0x66   : > { %993 = vmatprep.subr.mxu0 %v452_v3  ;;  %1030 = vmatprep.subr.mxu1 %v532_v1  ;;  %v450_v6 = vld [vmem:[#allocation10 + $0x68] sm:$0xff]  ;;  %v448_v8 = vld [vmem:[#allocation10 + $0x58] sm:$0xff]  ;;  %v447_v9 = vld [vmem:[#allocation10 + $0x50] sm:$0xff]  ;;  %p1269_p11 = scmp.ne.s32.totalorder %s1613_s8, %s1268_s0  ;;  %s1365_s13 = smov [#allocation12]  }
  0x67   : > { %994 = vmatpush3.msra.mxu0 %v452_v3  ;;  %1031 = vmatpush3.msra.mxu1 %v532_v1  ;;  %v446_v10 = vld [vmem:[#allocation10 + $0x48] sm:$0xff]  ;;  %v445_v11 = vld [vmem:[#allocation10 + $0x40] sm:$0xff]  ;;  %v444_v12 = vld [vmem:[#allocation10 + $0x38] sm:$0xff]  ;;  %v727_v27 = vsub.s32 0, %v726_v26 }
  0x68   : > { %995 = vmatprep.subr.mxu0 %v451_v4  ;;  %1033 = vmatmul.mubr.msk.f32.vlgmr.msra.gmra.mxu1 %vm536_vm0, %v531_v5  ;;  %v443_v13 = vld [vmem:[#allocation10 + $0x30] sm:$0xff]  ;;  %v442_v14 = vld [vmem:[#allocation10 + $0x28] sm:$0xff]  ;;  %v441_v15 = vld [vmem:[#allocation10 + $0x20] sm:$0xff]  ;;  %p1270_p10 = pnand %p1269_p11, %p1504_p12 }
  0x69   : > { %1035 = vmatprep.subr.mxu1 %v452_v3  ;;  %996 = vmatpush3.msra.mxu0 %v451_v4  ;;  %v440_v16 = vld [vmem:[#allocation10 + $0x18] sm:$0xff]  ;;  %v439_v17 = vld [vmem:[#allocation10 + $0x10] sm:$0xff]  ;;  %v438_v18 = vld [vmem:[#allocation10 + $0x8] sm:$0xff] }
  0x6a   : > { %1036 = vmatpush3.msra.mxu1 %v452_v3  ;;  %997 = vmatprep.subr.mxu0 %v450_v6  ;;  %v437_v19 = vld [vmem:[#allocation10] sm:$0xff]  ;;  %v436_v21 = vld [vmem:[%s362_s9 + $0x8] sm:$0xff]  ;;  %p1271_p0 = pneg %p1270_p10 }
  0x6b   : > { %1037 = vmatprep.subr.mxu1 %v451_v4  ;;  %998 = vmatpush3.msra.mxu0 %v450_v6  ;;  %v435_v20 = vld [vmem:[%s362_s9] sm:$0xff]  ;;  %s1272_s9 = sshll.u32 %s1365_s13, 4  ;;  %s1273_s9 = int_to_ptr.vmem [resolvable:$false] %s1272_s9 }
  0x6c   : > { %1038 = vmatpush3.msra.mxu1 %v451_v4  ;;  %999 = vmatprep.subr.mxu0 %v449_v7  ;;  %v722_v25 = vld [vmem:[%s1672_s6] sm:$0x1]  ;;  %s1274_s14 = scalar_lea.vmem %s1273_s9, 512  ;;  %p1275_p8 = scmp.lt.s32.totalorder %s1613_s8, %s1273_s9 }
  0x6d   : > { %1039 = vmatprep.subr.mxu1 %v450_v6  ;;  %1000 = vmatpush3.msra.mxu0 %v449_v7  ;;  %vm723_vm1 = vcmp.gt.f32.partialorder %v722_v25, 0.5  ;;  %v942_v32 = vld [vmem:[%s1670_s4] ss:$0 sm:$0xff]  ;;  %p1276_p5 = scmp.lt.s32.totalorder %s1274_s14, %s1268_s0 }
  0x6e   : > { %1040 = vmatpush3.msra.mxu1 %v450_v6  ;;  %1001 = vmatprep.subr.mxu0 %v448_v8  ;;  %v724_v29 = vsel %vm723_vm1, 1, %v1364_v28  ;;  %v943_v34 = vld [vmem:[%s1671_s5] ss:$0 sm:$0xff] }
  0x6f   : > { %1041 = vmatprep.subr.mxu1 %v449_v7  ;;  %1002 = vmatpush3.msra.mxu0 %v448_v8  ;;  %v728_v30 = vrot.slane %v724_v29, %v727_v27  ;;  %p1277_p1 = por %p1276_p5, %p1275_p8 }
  0x70   : > { %1042 = vmatpush3.msra.mxu1 %v449_v7  ;;  %1003 = vmatprep.subr.mxu0 %v447_v9 }
  0x71   : > { %1043 = vmatprep.subr.mxu1 %v448_v8  ;;  %1004 = vmatpush3.msra.mxu0 %v447_v9  ;;  %vm729_vm2 = vcmp.eq.s32.totalorder %v728_v30, 1  ;;  %p1278_p6 = pnand %p1277_p1, %p1271_p0 }
  0x72   : > { %1044 = vmatpush3.msra.mxu1 %v448_v8  ;;  %1005 = vmatprep.subr.mxu0 %v446_v10 }
  0x73   : > { %1045 = vmatprep.subr.mxu1 %v447_v9  ;;  %1006 = vmatpush3.msra.mxu0 %v446_v10 }
  0x74   : > { %1046 = vmatpush3.msra.mxu1 %v447_v9  ;;  %1007 = vmatprep.subr.mxu0 %v445_v11 }
  0x75   : > { %1047 = vmatprep.subr.mxu1 %v446_v10  ;;  %1008 = vmatpush3.msra.mxu0 %v445_v11 }
  0x76   : > { %1048 = vmatpush3.msra.mxu1 %v446_v10  ;;  %1009 = vmatprep.subr.mxu0 %v444_v12 }
  0x77   : > { %1049 = vmatprep.subr.mxu1 %v445_v11  ;;  %1010 = vmatpush3.msra.mxu0 %v444_v12 }
  0x78   : > { %1050 = vmatpush3.msra.mxu1 %v445_v11  ;;  %1011 = vmatprep.subr.mxu0 %v443_v13 }
  0x79   : > { %1051 = vmatprep.subr.mxu1 %v444_v12  ;;  %1012 = vmatpush3.msra.mxu0 %v443_v13 }
  0x7a   : > { %1052 = vmatpush3.msra.mxu1 %v444_v12  ;;  %1013 = vmatprep.subr.mxu0 %v442_v14 }
  0x7b   : > { %1053 = vmatprep.subr.mxu1 %v443_v13  ;;  %1014 = vmatpush3.msra.mxu0 %v442_v14 }
  0x7c   : > { %1054 = vmatpush3.msra.mxu1 %v443_v13  ;;  %1015 = vmatprep.subr.mxu0 %v441_v15 }
  0x7d   : > { %1055 = vmatprep.subr.mxu1 %v442_v14  ;;  %1016 = vmatpush3.msra.mxu0 %v441_v15 }
  0x7e   : > { %1056 = vmatpush3.msra.mxu1 %v442_v14  ;;  %1017 = vmatprep.subr.mxu0 %v440_v16 }
  0x7f   : > { %1057 = vmatprep.subr.mxu1 %v441_v15  ;;  %1018 = vmatpush3.msra.mxu0 %v440_v16 }
  0x80   : > { %1058 = vmatpush3.msra.mxu1 %v441_v15  ;;  %1019 = vmatprep.subr.mxu0 %v439_v17 }
  0x81   : > { %1059 = vmatprep.subr.mxu1 %v440_v16  ;;  %1020 = vmatpush3.msra.mxu0 %v439_v17 }
  0x82   : > { %1060 = vmatpush3.msra.mxu1 %v440_v16  ;;  %1021 = vmatprep.subr.mxu0 %v438_v18 }
  0x83   : > { %1061 = vmatprep.subr.mxu1 %v439_v17  ;;  %1022 = vmatpush3.msra.mxu0 %v438_v18 }
  0x84   : > { %1062 = vmatpush3.msra.mxu1 %v439_v17  ;;  %1023 = vmatprep.subr.mxu0 %v437_v19 }
  0x85   : > { %1063 = vmatprep.subr.mxu1 %v438_v18  ;;  %1024 = vmatpush3.msra.mxu0 %v437_v19 }
  0x86   : > { %1064 = vmatpush3.msra.mxu1 %v438_v18  ;;  %1025 = vmatprep.mubr.f32.mxu0 %v435_v20 }
  0x87   : > { %1065 = vmatprep.subr.mxu1 %v437_v19  ;;  %1026 = vmatmul.mubr.f32.vlgmr.msra.gmra.mxu0 %v436_v21 }
  0x88   : > { %1066 = vmatpush3.msra.mxu1 %v437_v19 }
 0x128   : > { %v1034_v22 = vpop.f32.mrf.mxu1 }
 0x12a   : > { %v609_v23 = vpop.f32.mrf.mxu1 }
 0x12b   : > { %1067 = vmatprep.mubr.f32.mxu1 %v609_v23 }
 0x12c   : > { %1068 = vmatmul.mubr.f32.vlgmr.msra.gmra.mxu1 %v1034_v22 }
 0x147   : > { %v1027_v31 = vpop.f32.mrf.mxu0 }
 0x149   : > { %v519_v36 = vpop.f32.mrf.mxu0 }
 0x1ec   : > { %v1069_v33 = vpop.f32.mrf.mxu1 }
 0x1ed   : > { %v731_v35 = vsel %vm729_vm2, %v1069_v33, %v1027_v31 }
 0x1ee   : > { %v739_v37 = vadd.f32 %v942_v32, %v731_v35  ;;  %v713_v38 = vpop.f32.mrf.mxu1 }
 0x1ef   : > { %v730_v39 = vsel %vm729_vm2, %v713_v38, %v519_v36 }
 0x1f0   : > { %vm741_vm3 = vcmp.ge.f32.partialorder %v739_v37, 0.0  ;;  %v749_v40 = vmul.f32 %v943_v34, %v739_v37  ;;  %v738_v41 = vadd.f32 %v942_v32, %v730_v39 }
 0x1f2   : > { %v751_v42 = vsel %vm741_vm3, %v739_v37, %v749_v40  ;;  %vm740_vm4 = vcmp.ge.f32.partialorder %v738_v41, 0.0  ;;  %v748_v43 = vmul.f32 %v943_v34, %v738_v41 }
 0x1f3   : > { %753 = vst [vmem:[%s424_s20 + $0x8] sm:$0xff] %v751_v42 }
 0x1f4   : > { %v750_v44 = vsel %vm740_vm4, %v738_v41, %v748_v43 }
 0x1f5   : > { %752 = vst [vmem:[%s424_s20] sm:$0xff] %v750_v44 }
 0x1f6   : > { %1281 = shalt.err (!%p1278_p6)
}
 0x1f7   : > { %s1282_s21 = scalar_lea.hbm %s1618_s29, 256  ;;  %s1286_s17 = scalar_lea.hbm %s1673_s7, 512 }
 0x1f8   : > { %p1283_p9 = scmp.ne.s32.totalorder %s1618_s29, %s1282_s21  ;;  %p1287_p13 = scmp.lt.s32.totalorder %s1618_s29, %s1673_s7 }
 0x1f9   : > { %p1288_p7 = scmp.lt.s32.totalorder %s1286_s17, %s1282_s21 }
 0x1fa   : > { %p1284_p4 = pnand %p1283_p9, %p1504_p12 }
 0x1fb   : > { %p1289_p2 = por %p1288_p7, %p1287_p13 }
 0x1fc   : > { %p1285_p3 = pneg %p1284_p4 }
 0x1fe   : > { %p1290_p11 = pnand %p1289_p2, %p1285_p3 }
 0x200   : > { %1293 = shalt.err (!%p1290_p11)
}
 0x201   : > { %s1366_s1 = smov 128   ;;  %s1367_s12 = smov 8  }
 0x202   : > { %1080 = dma.vmem_to_hbm [thread:$0]  (%p1504_p12), %s1613_s8, 256, %s1618_s29, %s755_s27, %s1366_s1, %s1366_s1, %s1367_s12  }
 0x203 PF: > { %s1707_s15 = sld [smem:[#allocation21_spill]]  ;;  %s785_s16 = sand.u32 1, %s1336_s24  }
 0x204   : > { %s1708_s20 = sld [smem:[#allocation18_spill]]  ;;  %s786_s28 = scalar_lea.sflag [#allocation6], %s785_s16 }
 0x209   : > { %p1709_p10 = scmp.ne.s32.totalorder %s1707_s15, 0 }
 0x20a   : > { %p1710_p0 = scmp.ge.s32.totalorder %s1708_s20, 2 }
 0x20c   : > { %p1097_p8 = pnand %p1710_p0, %p1709_p10 }
 0x20e   : > { %p1098_p5 = pneg %p1097_p8 }
 0x210   : > { %1331 = dma.done.wait (%p1098_p5), %s786_s28, 256  }
 0x211   : > { %1333 = vsyncadd (%p1098_p5), %s786_s28, 4294967040  ;;  %s27_s29 = sadd.s32 1, %s1708_s20   ;;  %s1711_s18 = sld [smem:[#allocation20_spill]] }
 0x212   : > { %p24_p1 = scmp.ge.s32.totalorder %s27_s29, 4   ;;  %s1712_s27 = sld [smem:[#allocation17_spill]] }
 0x213   : > { %s1713_s28 = sld [smem:[#allocation19_spill]]  ;;  %s1714_s24 = smov %s1340_s25 }
 0x214   : > { %s1715_s25 = smov %s1344_s26  ;;  %26 = sbr.rel (!%p24_p1) target bundleno = 12 (0xc), region = 129 }
 0x217   : > { %s1716_s26 = smov %s1711_s18 }
 0x219   :  { %791 = vsyncpa [#allocation5], 1 }
 0x21a   :  { %793 = vsyncpa [#allocation5 + $0x1], 1 }
 0x21b   :  { %794 = vsyncpa [#allocation8], 1 }
 0x21c   :  { %796 = vsyncpa [#allocation8 + $0x1], 1 }
 0x21d   :  { %797 = vsyncpa [#allocation11], 1 }
 0x21e   :  { %798 = vsyncpa [#allocation6], 1 }
 0x21f   :  { %800 = vsyncpa [#allocation6 + $0x1], 1 }

</bundles_post_ra>
